<compile_context>
chip_gen: v7x
topology: tpu7x:2x2x1
jax: 0.10.0
libtpu: 0.0.40
codegen_flags: <defaults>
</compile_context>

<pallas_src>
import functools

import jax
import jax.numpy as jnp
from jax import lax
from jax.experimental import pallas as pl
from jax.experimental.pallas import tpu as pltpu

D_IN, H1, H2, H3, D_OUT = 96, 67, 38, 10, 2

# Batch tile: large enough to amortize per-step overhead and reach the HBM
# roofline (>=512 rows), small enough that double-buffered bf16 x tiles plus
# f32 intermediates stay far under v7x's 64 MiB VMEM.
DEFAULT_BLOCK_B = 1024


def _round_up(n, m):
    return ((n + m - 1) // m) * m


def mlp_kernel(x_ref,
               w1_ref, b1_ref,
               w2_ref, b2_ref,
               w3_ref, b3_ref,
               w4t_ref, b4t_ref,
               o_ref):
    """Fused 4-layer MLP forward for one batch tile; writes (D_OUT, block_b)."""
    x = x_ref[...]  # (block_b, 96) bf16

    # hidden1 + sigmoid   (dropout = identity at inference)
    h = jnp.dot(x, w1_ref[...], preferred_element_type=jnp.float32) + b1_ref[...]
    h = jax.nn.sigmoid(h)

    # hidden2 + sigmoid   (activations stay f32 in-register; weights are tiny)
    h = jnp.dot(h, w2_ref[...].astype(jnp.float32),
                preferred_element_type=jnp.float32) + b2_ref[...]
    h = jax.nn.sigmoid(h)

    # hidden3 + sigmoid
    h = jnp.dot(h, w3_ref[...].astype(jnp.float32),
                preferred_element_type=jnp.float32) + b3_ref[...]
    h = jax.nn.sigmoid(h)

    # Output layer computed directly transposed: (D_OUT, block_b), so the final
    # store is lane-dense.  dot_general with contraction ((1,),(1,)) is the
    # trans_b matmul  w4t @ h.T  == (h @ w4).T  (no explicit transpose of h).
    logits_t = lax.dot_general(
        w4t_ref[...].astype(jnp.float32), h,
        dimension_numbers=(((1,), (1,)), ((), ())),
        preferred_element_type=jnp.float32) + b4t_ref[...]

    # LogSoftmax over the class axis, which is now the 2-row sublane axis.
    m = jnp.max(logits_t, axis=0, keepdims=True)
    lse = jnp.log(jnp.sum(jnp.exp(logits_t - m), axis=0, keepdims=True)) + m
    o_ref[...] = (logits_t - lse).astype(o_ref.dtype)

    # TODO(synk): training-mode dropout (p=0.15) would need pltpu.prng_* masks;
    # forward semantics here are inference (identity), and the never-called
    # BatchNorm1d modules are intentionally omitted.


@functools.partial(jax.jit, static_argnames=("block_b",))
def network_forward(x, params, *, block_b=None):
    """x: (B, ...) -> flattened to (B, 96). Returns log-probabilities (B, 2)."""
    b = x.shape[0]
    x = x.reshape(b, -1)
    assert x.shape[1] == D_IN, f"expected {D_IN} flattened features, got {x.shape[1]}"

    if block_b is None:
        block_b = min(DEFAULT_BLOCK_B, _round_up(b, 8))
    b_pad = _round_up(b, block_b)

    # HBM-facing data in bf16 (halves the dominant x read traffic).
    x = x.astype(jnp.bfloat16)
    if b_pad != b:
        x = jnp.pad(x, ((0, b_pad - b), (0, 0)))

    (w1, b1), (w2, b2), (w3, b3), (w4, b4) = params
    w1 = w1.astype(jnp.bfloat16)
    w2 = w2.astype(jnp.bfloat16)
    w3 = w3.astype(jnp.bfloat16)
    w4t = w4.T.astype(jnp.bfloat16)                    # (D_OUT, H3)
    b4t = b4.reshape(D_OUT, 1).astype(jnp.float32)     # (D_OUT, 1)
    b1 = b1.astype(jnp.float32)
    b2 = b2.astype(jnp.float32)
    b3 = b3.astype(jnp.float32)

    def full(shape):
        # whole-array block, kept VMEM-resident across the batch grid axis
        return pl.BlockSpec(shape, lambda i: (0, 0))

    n_w = D_IN * H1 + H1 * H2 + H2 * H3 + H3 * D_OUT
    n_b = H1 + H2 + H3 + D_OUT
    cost = pl.CostEstimate(
        flops=2 * b_pad * n_w,
        transcendentals=b_pad * (H1 + H2 + H3 + D_OUT),
        bytes_accessed=b_pad * D_IN * 2 + b_pad * D_OUT * 4 + n_w * 2 + n_b * 4,
    )

    grid = (b_pad // block_b,)
    out_t = pl.pallas_call(
        mlp_kernel,
        out_shape=jax.ShapeDtypeStruct((D_OUT, b_pad), jnp.float32),
        grid_spec=pltpu.PrefetchScalarGridSpec(
            num_scalar_prefetch=0,
            grid=grid,
            in_specs=[
                pl.BlockSpec((block_b, D_IN), lambda i: (i, 0)),
                full((D_IN, H1)), full((1, H1)),
                full((H1, H2)), full((1, H2)),
                full((H2, H3)), full((1, H3)),
                full((D_OUT, H3)), full((D_OUT, 1)),
            ],
            out_specs=pl.BlockSpec((D_OUT, block_b), lambda i: (0, i)),
        ),
        compiler_params=pltpu.CompilerParams(
            dimension_semantics=("parallel",),
            vmem_limit_bytes=32 * 1024 * 1024,
        ),
        cost_estimate=cost,
    )(x, w1, b1, w2, b2, w3, b3, w4t, b4t)

    # Back to the PyTorch-facing (B, 2) layout; drop batch padding.
    return out_t.T[:b]


def init_params(key):
    """Deterministic init mimicking PyTorch nn.Linear default U[-1/sqrt(fan_in), +].

    Weights are stored as (in_features, out_features); biases as (1, out)."""
    dims = [(D_IN, H1), (H1, H2), (H2, H3), (H3, D_OUT)]
    params = []
    for fan_in, fan_out in dims:
        key, kw, kb = jax.random.split(key, 3)
        bound = 1.0 / jnp.sqrt(float(fan_in))
        w = jax.random.uniform(kw, (fan_in, fan_out), jnp.float32, -bound, bound)
        bvec = jax.random.uniform(kb, (1, fan_out), jnp.float32, -bound, bound)
        params.append((w, bvec))
    return params


def reference_forward(x, params):
    """Pure-JAX reference, using the same bf16 rounding of x/weights as the kernel."""
    cast = lambda a: a.astype(jnp.bfloat16).astype(jnp.float32)
    h = cast(x.reshape(x.shape[0], -1))
    (w1, b1), (w2, b2), (w3, b3), (w4, b4) = params
    h = jax.nn.sigmoid(h @ cast(w1) + b1)
    h = jax.nn.sigmoid(h @ cast(w2) + b2)
    h = jax.nn.sigmoid(h @ cast(w3) + b3)
    logits = h @ cast(w4) + b4
    return jax.nn.log_softmax(logits, axis=1)


if __name__ == "__main__":
    key = jax.random.PRNGKey(0)
    kx, kp = jax.random.split(key)
    params = init_params(kp)

    # Small check (single tile).
    x_small = jax.random.normal(kx, (8, D_IN), jnp.float32)
    out_small = jax.block_until_ready(network_forward(x_small, params))
    ref_small = reference_forward(x_small, params)
    assert out_small.shape == (8, D_OUT)
    assert jnp.allclose(out_small, ref_small, atol=2e-3, rtol=2e-3), "small-batch mismatch"

    # Multi-tile check: exercises the pipelined batch grid and ragged-batch padding.
    x_big = jax.random.normal(kx, (2050, D_IN), jnp.float32)
    out_big = jax.block_until_ready(network_forward(x_big, params))
    ref_big = reference_forward(x_big, params)
    assert out_big.shape == (2050, D_OUT)
    assert jnp.allclose(out_big, ref_big, atol=2e-3, rtol=2e-3), "big-batch mismatch"

    print("KERNEL_OK")
</pallas_src>

<mosaic_0001>
module attributes {stable_mosaic.version = 11 : i64} {
  func.func @mlp_kernel(%arg0: i32, %arg1: memref<8x96xbf16, #tpu.memory_space<vmem>>, %arg2: memref<96x67xbf16, #tpu.memory_space<vmem>>, %arg3: memref<1x67xf32, #tpu.memory_space<vmem>>, %arg4: memref<67x38xbf16, #tpu.memory_space<vmem>>, %arg5: memref<1x38xf32, #tpu.memory_space<vmem>>, %arg6: memref<38x10xbf16, #tpu.memory_space<vmem>>, %arg7: memref<1x10xf32, #tpu.memory_space<vmem>>, %arg8: memref<2x10xbf16, #tpu.memory_space<vmem>>, %arg9: memref<2x1xf32, #tpu.memory_space<vmem>>, %arg10: memref<2x8xf32, #tpu.memory_space<vmem>>) attributes {dimension_semantics = [#tpu.dimension_semantics<parallel>], iteration_bounds = array<i64: 1>, scalar_prefetch = 0 : i64, scratch_operands = 0 : i64, tpu.core_type = #tpu.core_type<tc>, window_params = [{transform_indices = @transform_0, window_bounds = array<i64: 8, 96>}, {pipeline_mode = #tpu.pipeline_mode<synchronous>, transform_indices = @transform_1, window_bounds = array<i64: 96, 67>}, {pipeline_mode = #tpu.pipeline_mode<synchronous>, transform_indices = @transform_2, window_bounds = array<i64: 1, 67>}, {pipeline_mode = #tpu.pipeline_mode<synchronous>, transform_indices = @transform_3, window_bounds = array<i64: 67, 38>}, {pipeline_mode = #tpu.pipeline_mode<synchronous>, transform_indices = @transform_4, window_bounds = array<i64: 1, 38>}, {pipeline_mode = #tpu.pipeline_mode<synchronous>, transform_indices = @transform_5, window_bounds = array<i64: 38, 10>}, {pipeline_mode = #tpu.pipeline_mode<synchronous>, transform_indices = @transform_6, window_bounds = array<i64: 1, 10>}, {pipeline_mode = #tpu.pipeline_mode<synchronous>, transform_indices = @transform_7, window_bounds = array<i64: 2, 10>}, {pipeline_mode = #tpu.pipeline_mode<synchronous>, transform_indices = @transform_8, window_bounds = array<i64: 2, 1>}, {transform_indices = @transform_9, window_bounds = array<i64: 2, 8>}]} {
    %c0 = arith.constant 0 : index
    %c0_0 = arith.constant 0 : index
    %0 = vector.load %arg1[%c0, %c0_0] : memref<8x96xbf16, #tpu.memory_space<vmem>>, vector<8x96xbf16>
    %c0_1 = arith.constant 0 : index
    %c0_2 = arith.constant 0 : index
    %1 = vector.load %arg2[%c0_1, %c0_2] : memref<96x67xbf16, #tpu.memory_space<vmem>>, vector<96x67xbf16>
    %cst = arith.constant dense<0.000000e+00> : vector<8x67xf32>
    %2 = tpu.matmul %0, %1, %cst {dimension_numbers = #tpu.dot_dimension_numbers<[1], [0], [0], [1], [0, 0, 1, 1], [], []>} : vector<8x96xbf16>, vector<96x67xbf16>, vector<8x67xf32> -> vector<8x67xf32>
    %c0_3 = arith.constant 0 : index
    %c0_4 = arith.constant 0 : index
    %3 = vector.load %arg3[%c0_3, %c0_4] : memref<1x67xf32, #tpu.memory_space<vmem>>, vector<1x67xf32>
    %4 = vector.broadcast %3 : vector<1x67xf32> to vector<8x67xf32>
    %5 = arith.addf %2, %4 : vector<8x67xf32>
    %6 = arith.negf %5 : vector<8x67xf32>
    %7 = math.exp %6 : vector<8x67xf32>
    %cst_5 = arith.constant 1.000000e+00 : f32
    %8 = vector.broadcast %cst_5 : f32 to vector<8x67xf32>
    %9 = arith.addf %8, %7 : vector<8x67xf32>
    %10 = arith.divf %8, %9 : vector<8x67xf32>
    %c0_6 = arith.constant 0 : index
    %c0_7 = arith.constant 0 : index
    %11 = vector.load %arg4[%c0_6, %c0_7] : memref<67x38xbf16, #tpu.memory_space<vmem>>, vector<67x38xbf16>
    %12 = arith.extf %11 : vector<67x38xbf16> to vector<67x38xf32>
    %cst_8 = arith.constant dense<0.000000e+00> : vector<8x38xf32>
    %13 = tpu.matmul %10, %12, %cst_8 {dimension_numbers = #tpu.dot_dimension_numbers<[1], [0], [0], [1], [0, 0, 1, 1], [], []>} : vector<8x67xf32>, vector<67x38xf32>, vector<8x38xf32> -> vector<8x38xf32>
    %c0_9 = arith.constant 0 : index
    %c0_10 = arith.constant 0 : index
    %14 = vector.load %arg5[%c0_9, %c0_10] : memref<1x38xf32, #tpu.memory_space<vmem>>, vector<1x38xf32>
    %15 = vector.broadcast %14 : vector<1x38xf32> to vector<8x38xf32>
    %16 = arith.addf %13, %15 : vector<8x38xf32>
    %17 = arith.negf %16 : vector<8x38xf32>
    %18 = math.exp %17 : vector<8x38xf32>
    %cst_11 = arith.constant 1.000000e+00 : f32
    %19 = vector.broadcast %cst_11 : f32 to vector<8x38xf32>
    %20 = arith.addf %19, %18 : vector<8x38xf32>
    %21 = arith.divf %19, %20 : vector<8x38xf32>
    %c0_12 = arith.constant 0 : index
    %c0_13 = arith.constant 0 : index
    %22 = vector.load %arg6[%c0_12, %c0_13] : memref<38x10xbf16, #tpu.memory_space<vmem>>, vector<38x10xbf16>
    %23 = arith.extf %22 : vector<38x10xbf16> to vector<38x10xf32>
    %cst_14 = arith.constant dense<0.000000e+00> : vector<8x10xf32>
    %24 = tpu.matmul %21, %23, %cst_14 {dimension_numbers = #tpu.dot_dimension_numbers<[1], [0], [0], [1], [0, 0, 1, 1], [], []>} : vector<8x38xf32>, vector<38x10xf32>, vector<8x10xf32> -> vector<8x10xf32>
    %c0_15 = arith.constant 0 : index
    %c0_16 = arith.constant 0 : index
    %25 = vector.load %arg7[%c0_15, %c0_16] : memref<1x10xf32, #tpu.memory_space<vmem>>, vector<1x10xf32>
    %26 = vector.broadcast %25 : vector<1x10xf32> to vector<8x10xf32>
    %27 = arith.addf %24, %26 : vector<8x10xf32>
    %28 = arith.negf %27 : vector<8x10xf32>
    %29 = math.exp %28 : vector<8x10xf32>
    %cst_17 = arith.constant 1.000000e+00 : f32
    %30 = vector.broadcast %cst_17 : f32 to vector<8x10xf32>
    %31 = arith.addf %30, %29 : vector<8x10xf32>
    %32 = arith.divf %30, %31 : vector<8x10xf32>
    %c0_18 = arith.constant 0 : index
    %c0_19 = arith.constant 0 : index
    %33 = vector.load %arg8[%c0_18, %c0_19] : memref<2x10xbf16, #tpu.memory_space<vmem>>, vector<2x10xbf16>
    %34 = arith.extf %33 : vector<2x10xbf16> to vector<2x10xf32>
    %cst_20 = arith.constant dense<0.000000e+00> : vector<2x8xf32>
    %35 = tpu.matmul %34, %32, %cst_20 {dimension_numbers = #tpu.dot_dimension_numbers<[1], [1], [0], [0], [0, 0, 1, 0], [], []>} : vector<2x10xf32>, vector<8x10xf32>, vector<2x8xf32> -> vector<2x8xf32>
    %c0_21 = arith.constant 0 : index
    %c0_22 = arith.constant 0 : index
    %36 = vector.load %arg9[%c0_21, %c0_22] : memref<2x1xf32, #tpu.memory_space<vmem>>, vector<2x1xf32>
    %37 = vector.broadcast %36 : vector<2x1xf32> to vector<2x8xf32>
    %38 = arith.addf %35, %37 : vector<2x8xf32>
    %cst_23 = arith.constant dense<0xFF800000> : vector<8xf32>
    %39 = vector.multi_reduction <maximumf>, %38, %cst_23 [0] : vector<2x8xf32> to vector<8xf32>
    %40 = vector.shape_cast %39 : vector<8xf32> to vector<1x8xf32>
    %41 = vector.broadcast %40 : vector<1x8xf32> to vector<2x8xf32>
    %42 = arith.subf %38, %41 : vector<2x8xf32>
    %43 = math.exp %42 : vector<2x8xf32>
    %cst_24 = arith.constant dense<0.000000e+00> : vector<8xf32>
    %44 = vector.multi_reduction <add>, %43, %cst_24 [0] : vector<2x8xf32> to vector<8xf32>
    %45 = vector.shape_cast %44 : vector<8xf32> to vector<1x8xf32>
    %46 = math.log %45 : vector<1x8xf32>
    %47 = arith.addf %46, %40 : vector<1x8xf32>
    %48 = vector.broadcast %47 : vector<1x8xf32> to vector<2x8xf32>
    %49 = arith.subf %38, %48 : vector<2x8xf32>
    %c0_25 = arith.constant 0 : index
    %c0_26 = arith.constant 0 : index
    %50 = vector.load %arg10[%c0_25, %c0_26] : memref<2x8xf32, #tpu.memory_space<vmem>>, vector<2x8xf32>
    tpu.vector_store %arg10[%c0_25, %c0_26], %49 {strides = array<i32>} : memref<2x8xf32, #tpu.memory_space<vmem>>, vector<2x8xf32>,
    return
  }
  func.func @transform_0(%arg0: i32) -> (i32, i32) {
    %c0_i32 = arith.constant 0 : i32
    %c0_i32_0 = arith.constant 0 : i32
    return %arg0, %c0_i32 : i32, i32
  }
  func.func @transform_1(%arg0: i32) -> (i32, i32) {
    %c0_i32 = arith.constant 0 : i32
    %c0_i32_0 = arith.constant 0 : i32
    %c0_i32_1 = arith.constant 0 : i32
    return %c0_i32, %c0_i32_0 : i32, i32
  }
  func.func @transform_2(%arg0: i32) -> (i32, i32) {
    %c0_i32 = arith.constant 0 : i32
    %c0_i32_0 = arith.constant 0 : i32
    %c0_i32_1 = arith.constant 0 : i32
    return %c0_i32, %c0_i32_0 : i32, i32
  }
  func.func @transform_3(%arg0: i32) -> (i32, i32) {
    %c0_i32 = arith.constant 0 : i32
    %c0_i32_0 = arith.constant 0 : i32
    %c0_i32_1 = arith.constant 0 : i32
    return %c0_i32, %c0_i32_0 : i32, i32
  }
  func.func @transform_4(%arg0: i32) -> (i32, i32) {
    %c0_i32 = arith.constant 0 : i32
    %c0_i32_0 = arith.constant 0 : i32
    %c0_i32_1 = arith.constant 0 : i32
    return %c0_i32, %c0_i32_0 : i32, i32
  }
  func.func @transform_5(%arg0: i32) -> (i32, i32) {
    %c0_i32 = arith.constant 0 : i32
    %c0_i32_0 = arith.constant 0 : i32
    %c0_i32_1 = arith.constant 0 : i32
    return %c0_i32, %c0_i32_0 : i32, i32
  }
  func.func @transform_6(%arg0: i32) -> (i32, i32) {
    %c0_i32 = arith.constant 0 : i32
    %c0_i32_0 = arith.constant 0 : i32
    %c0_i32_1 = arith.constant 0 : i32
    return %c0_i32, %c0_i32_0 : i32, i32
  }
  func.func @transform_7(%arg0: i32) -> (i32, i32) {
    %c0_i32 = arith.constant 0 : i32
    %c0_i32_0 = arith.constant 0 : i32
    %c0_i32_1 = arith.constant 0 : i32
    return %c0_i32, %c0_i32_0 : i32, i32
  }
  func.func @transform_8(%arg0: i32) -> (i32, i32) {
    %c0_i32 = arith.constant 0 : i32
    %c0_i32_0 = arith.constant 0 : i32
    %c0_i32_1 = arith.constant 0 : i32
    return %c0_i32, %c0_i32_0 : i32, i32
  }
  func.func @transform_9(%arg0: i32) -> (i32, i32) {
    %c0_i32 = arith.constant 0 : i32
    %c0_i32_0 = arith.constant 0 : i32
    return %c0_i32, %arg0 : i32, i32
  }
}

</mosaic_0001>

<bundles_post_ra>
// kernel: network_forward.1
= control target key start
LH: loop header
LB: loop body
LE: loop exit
PB: predicated region body
PF: predicated region fallthrough
CT: control target
= control target key end

     0   :  { %v669_v1 = vmov 0.0   ;;  %vm670_vm0 = vmmov 0   ;;  %s816_s0 = inlined_call_operand.vmem [shape: bf16[8,96], index: 0, kind: input, shape index: {}]   ;;  %s817_s1 = inlined_call_operand.vmem [shape: bf16[96,67], index: 1, kind: input, shape index: {}]   ;;  %s818_s2 = inlined_call_operand.vmem [shape: f32[1,67], index: 2, kind: input, shape index: {}]   ;;  %s819_s3 = inlined_call_operand.vmem [shape: bf16[67,38], index: 3, kind: input, shape index: {}]   ;;  %s820_s4 = inlined_call_operand.vmem [shape: f32[1,38], index: 4, kind: input, shape index: {}]   ;;  %s821_s5 = inlined_call_operand.vmem [shape: bf16[38,10], index: 5, kind: input, shape index: {}]   ;;  %s822_s6 = inlined_call_operand.vmem [shape: f32[1,10], index: 6, kind: input, shape index: {}]   ;;  %s823_s7 = inlined_call_operand.vmem [shape: bf16[2,10], index: 7, kind: input, shape index: {}]   ;;  %s824_s8 = inlined_call_operand.vmem [shape: f32[2,1], index: 8, kind: input, shape index: {}]   ;;  %s825_s9 = inlined_call_operand.hbm [shape: f32[2,8], index: 9, kind: output, shape index: {}]  }
   0x1   :  { %v623_v0 = vld [vmem:[%s817_s1] sm:$0xff]   ;;  %544 = vmatprep.subr.bf16.mxu0 %v669_v1  ;;  %v624_v2 = vld [vmem:[%s817_s1 + $0x8] sm:$0xff]   ;;  %556 = vmatprep.mubr.msk.bf16.mxu0 %vm670_vm0, %v669_v1  ;;  %v625_v3 = vld [vmem:[%s817_s1 + $0x10] sm:$0xff]  }
   0x2   :  { %545 = vmatpush3.bf16.msra.mxu0 %v623_v0  ;;  %578 = vmatprep.mubr.msk.f32.mxu1 %vm670_vm0, %v669_v1 }
   0x3   :  { %546 = vmatprep.subr.bf16.mxu0 %v669_v1 }
   0x6   :  { %547 = vmatpush3.bf16.msra.mxu0 %v624_v2 }
   0x7   :  { %14 = vsyncpa [#allocation3], 0  ;;  %548 = vmatprep.subr.bf16.mxu0 %v669_v1  ;;  %v626_v4 = vld [vmem:[%s817_s1 + $0x18] sm:$0xff]   ;;  %v627_v5 = vld [vmem:[%s817_s1 + $0x20] sm:$0xff]   ;;  %vm90_vm1 = vcmask 785408   ;;  %v671_v8 = vmov 0.0|0.0  }
   0x8   :  { %v628_v6 = vld [vmem:[%s817_s1 + $0x28] sm:$0xff]   ;;  %v34_v7 = vld [vmem:[%s816_s0] sm:$0xf]  ;;  %599 = vmatprep.subr.bf16.mxu1 %v671_v8  ;;  %v516_v11 = vld [vmem:[%s819_s3 + $0x10] sm:$0xff]   ;;  %vm169_vm2 = vcmask 1042432   ;;  %vm165_vm3 = vcmask 547840  }
   0x9   :  { %v492_v9 = vld [vmem:[%s819_s3] sm:$0xff]   ;;  %v515_v10 = vld [vmem:[%s819_s3 + $0x8] sm:$0xff]   ;;  %v517_v12 = vld [vmem:[%s819_s3 + $0x18] sm:$0xff]   ;;  %vm270_vm4 = vcmask 1045504   ;;  %vm266_vm5 = vcmask 310272   ;;  %v672_v38 = vmov 0  }
   0xa   :  { %549 = vmatpush3.bf16.msra.mxu0 %v625_v3  ;;  %601 = vmatpush3.bf16.msra.mxu1 %v492_v9  ;;  %v148_v13 = vld [vmem:[%s819_s3 + $0x20] sm:$0x3]  ;;  %v518_v26 = vld [vmem:[%s821_s5 + $0x8] sm:$0xff]   ;;  %v253_v27 = vld [vmem:[%s821_s5 + $0x10] sm:$0x7]  ;;  %vm358_vm6 = vcmask 80896  }
   0xb   :  { %550 = vmatprep.subr.bf16.mxu0 %v669_v1  ;;  %602 = vmatprep.subr.bf16.mxu1 %v671_v8  ;;  %v157_v14 = vunpack.c.l.bf16 %v148_v13  ;;  %v472_v15 = vld [vmem:[%s818_s2] ss:$0 sm:$0xff]  ;;  %v258_v28 = vunpack.c.l.bf16 %v253_v27  ;;  %vm435_vm7 = vcmask 58368  }
   0xc   :  { %v508_v25 = vld [vmem:[%s821_s5] sm:$0xff]   ;;  %622 = vset.pattern.permute.xlu0 %v672_v38 }
   0xd   :  { %v481_v29 = vld [vmem:[%s820_s4] ss:$0 sm:$0xff] }
   0xe   :  { %551 = vmatpush3.bf16.msra.mxu0 %v626_v4  ;;  %604 = vmatpush3.bf16.msra.mxu1 %v515_v10  ;;  %v352_v37 = vld [vmem:[%s824_s8] sm:$0x3] }
   0xf   :  { %552 = vmatprep.subr.bf16.mxu0 %v669_v1  ;;  %605 = vmatprep.subr.bf16.mxu1 %v671_v8  ;;  %v485_v39 = vld [vmem:[%s822_s6] ss:$0 sm:$0xff]  ;;  %s673_s6 = smov [#allocation2]  }
  0x10   :  { %355 = vperm.xlu0 %622, %v352_v37   ;;  %v350_v46 = vld [vmem:[%s823_s7] sm:$0x1]  ;;  %s464_s7 = sshll.u32 %s673_s6, 4  ;;  %s465_s7 = int_to_ptr.vmem [resolvable:$true] %s464_s7 }
  0x11   :  { %v351_v48 = vunpack.c.l.bf16 %v350_v46  ;;  %s645_s8 = scalar_lea.vmem %s465_s7, 32  ;;  %p650_p1 = scmp.lt.s32.totalorder %s465_s7, %s465_s7 }
  0x12   :  { %553 = vmatpush3.bf16.msra.mxu0 %v627_v5  ;;  %607 = vmatpush3.bf16.msra.mxu1 %v516_v11  ;;  %p646_p0 = scmp.ne.s32.totalorder %s465_s7, %s645_s8  ;;  %p651_p2 = scmp.lt.s32.totalorder %s645_s8, %s645_s8 }
  0x13   :  { %554 = vmatprep.subr.bf16.mxu0 %v669_v1  ;;  %608 = vmatprep.subr.bf16.mxu1 %v671_v8 }
  0x14   :  { %p652_p3 = por %p651_p2, %p650_p1 }
  0x16   :  { %555 = vmatpush3.bf16.msra.mxu0 %v628_v6  ;;  %610 = vmatpush3.bf16.msra.mxu1 %v517_v12  ;;  %p653_p4 = pnand %p652_p3, %p646_p0 }
  0x17   :  { %594 = vmatprep.subr.mxu0 %v669_v1  ;;  %576 = vmatprep.subr.mxu1 %v669_v1 }
  0x19   :  { %557 = vmatmul.mubr.msk.bf16.vlgmr.msra.gmra.mrb[0].mxu0 %vm90_vm1, %v34_v7 }
  0x1a   :  { %596 = vmatprep.mubr.msk.f32.mxu0 %vm670_vm0, %v669_v1  ;;  %577 = vmatpush3.msk.msra.mxu1 %vm169_vm2, %v157_v14 }
  0x1b   :  { %611 = vmatprep.subr.bf16.mxu1 %v671_v8 }
  0x8f   :  { %v356_v49 = vpop.permute.xlu0 %355 }
  0xec   :  { %v128_v16 = vpop.f32.mrb[0].mxu0 }
  0xed   :  { %v129_v17 = vadd.f32 %v472_v15, %v128_v16  ;;  %v558_v18 = vpop.f32.mrb[1].mxu0 }
  0xee   :  { %v131_v19 = vpop.f32.mrb[2].mxu0 }
  0xef   :  { %v480_v20 = vmul.f32 -1.442695, %v129_v17  ;;  %v559_v21 = vpop.f32.mrb[3].mxu0 }
  0xf1   :  { %629 = vpow2.f32 %v480_v20 }
  0xfb   :  { %v630_v22 = vpop.eup %629 }
  0xfc   :  { %v137_v23 = vadd.f32 1.0, %v630_v22 }
  0xfe   :  { %631 = vrcp.f32 %v137_v23 }
 0x108   :  { %v632_v24 = vpop.eup %631 }
 0x109   :  { %579 = vmatmul.mubr.msk.f32.vlgmr.msra.gmra.mrb[0].mxu1 %vm165_vm3, %v632_v24 }
 0x10a   :  { %591 = vmatprep.mubr.msk.f32.mxu1 %vm670_vm0, %v669_v1  ;;  %613 = vmatpush3.bf16.msra.mxu1 %v508_v25 }
 0x10b   :  { %614 = vmatprep.subr.bf16.mxu1 %v671_v8 }
 0x10e   :  { %616 = vmatpush3.bf16.msra.mxu1 %v518_v26 }
 0x10f   :  { %589 = vmatprep.subr.mxu1 %v669_v1 }
 0x112   :  { %590 = vmatpush3.msk.msra.mxu1 %vm270_vm4, %v258_v28 }
 0x1dc   :  { %v239_v30 = vpop.f32.mrb[0].mxu1 }
 0x1dd   :  { %v240_v31 = vadd.f32 %v481_v29, %v239_v30  ;;  %v580_v32 = vpop.f32.mrb[1].mxu1 }
 0x1df   :  { %v484_v33 = vmul.f32 -1.442695, %v240_v31 }
 0x1e1   :  { %633 = vpow2.f32 %v484_v33 }
 0x1eb   :  { %v634_v34 = vpop.eup %633 }
 0x1ec   :  { %v246_v35 = vadd.f32 1.0, %v634_v34 }
 0x1ee   :  { %635 = vrcp.f32 %v246_v35 }
 0x1f8   :  { %v636_v36 = vpop.eup %635 }
 0x1f9   :  { %592 = vmatmul.mubr.msk.f32.vlgmr.msra.gmra.mrb[2].mxu1 %vm266_vm5, %v636_v36 }
 0x2cc   :  { %v340_v40 = vpop.f32.mrb[2].mxu1 }
 0x2cd   :  { %v341_v41 = vadd.f32 %v485_v39, %v340_v40  ;;  %v593_v42 = vpop.f32.mrb[3].mxu1 }
 0x2cf   :  { %v488_v43 = vmul.f32 -1.442695, %v341_v41 }
 0x2d1   :  { %637 = vpow2.f32 %v488_v43 }
 0x2db   :  { %v638_v44 = vpop.eup %637 }
 0x2dc   :  { %v347_v45 = vadd.f32 1.0, %v638_v44 }
 0x2de   :  { %639 = vrcp.f32 %v347_v45 }
 0x2e8   :  { %v640_v47 = vpop.eup %639 }
 0x2e9   :  { %595 = vmatpush3.xpose.msk.msra.mxu0 %vm358_vm6, %v640_v47 }
 0x2ec   :  { %597 = vmatmul.mubr.msk.f32.vlgmr.msra.gmra.mrb[4].mxu0 %vm358_vm6, %v351_v48 }
 0x3bf   :  { %v431_v50 = vpop.f32.mrb[4].mxu0 }
 0x3c0   :  { %v432_v51 = vadd.f32 %v431_v50, %v356_v49  ;;  %v598_v52 = vpop.f32.mrb[5].mxu0 }
 0x3c2   :  { %v436_v53 = vsel %vm435_vm7, %v432_v51, -inf }
 0x3c3   :  { %v437_v54 = vrot.slane %v436_v53, 4 }
 0x3c5   :  { %v438_v55 = vmax.f32 %v436_v53, %v437_v54 }
 0x3c7   :  { %v439_v56 = vrot.slane %v438_v55, 2 }
 0x3c9   :  { %v440_v57 = vmax.f32 %v438_v55, %v439_v56 }
 0x3cb   :  { %v441_v58 = vrot.slane %v440_v57, 1 }
 0x3cd   :  { %v442_v59 = vmax.f32 %v440_v57, %v441_v58 }
 0x3cf   :  { %v443_v60 = vsub.f32 %v432_v51, %v442_v59 }
 0x3d1   :  { %v444_v61 = vmul.f32 1.442695, %v443_v60 }
 0x3d3   :  { %641 = vpow2.f32 %v444_v61 }
 0x3dd   :  { %v642_v62 = vpop.eup %641 }
 0x3de   :  { %v446_v63 = vsel %vm435_vm7, %v642_v62, 0.0 }
 0x3df   :  { %v447_v0 = vrot.slane %v446_v63, 4 }
 0x3e1   :  { %v448_v1 = vadd.f32 %v447_v0, %v446_v63 }
 0x3e3   :  { %v449_v2 = vrot.slane %v448_v1, 2 }
 0x3e5   :  { %v450_v3 = vadd.f32 %v449_v2, %v448_v1 }
 0x3e7   :  { %v451_v4 = vrot.slane %v450_v3, 1 }
 0x3e9   :  { %v452_v5 = vadd.f32 %v451_v4, %v450_v3 }
 0x3eb   :  { %643 = vlog2.f32 %v452_v5 }
 0x3f5   :  { %v644_v6 = vpop.eup %643 }
 0x3f6   :  { %v454_v7 = vmul.f32 0.6931472, %v644_v6 }
 0x3f8   :  { %v455_v8 = vadd.f32 %v454_v7, %v442_v59 }
 0x3fa   :  { %v456_v9 = vsub.f32 %v432_v51, %v455_v8 }
 0x3fc   :  { %457 = vst.msk [vmem:[#allocation2] sm:$0x3] %vm435_vm7, %v456_v9 }
 0x3fd   :  { %656 = shalt.err (!%p653_p4)
}
 0x3fe   :  { %s657_s24 = scalar_lea.hbm %s825_s9, 32 }
 0x3ff   :  { %p658_p5 = scmp.ne.s32.totalorder %s825_s9, %s657_s24  ;;  %p661_p6 = scmp.lt.u32.totalorder %s657_s24, %s825_s9 }
 0x401   :  { %p663_p7 = pnand %p661_p6, %p658_p5 }
 0x403   :  { %666 = shalt.err (!%p663_p7)
}
 0x404   :  { %467 = dma.vmem_to_hbm [thread:$0]  %s465_s7, 32, %s825_s9, [#allocation3]  }
 0x405   :  { %667 = dma.done.wait [#allocation3], 32  }
 0x406   :  { %668 = vsyncadd [#allocation3], 4294967264 }
 0x407   :  { %471 = vsyncpa [#allocation3], 1 }

</bundles_post_ra>
